<compile_context>
chip_gen: v7x
topology: tpu7x:2x2x1
jax: 0.10.0
libtpu: 0.0.40
codegen_flags: <defaults>
</compile_context>

<pallas_src>
import functools

import numpy as np
import jax
import jax.numpy as jnp
from jax import lax
from jax.experimental import pallas as pl
from jax.experimental.pallas import tpu as pltpu


def _round_up(a, b):
    return ((a + b - 1) // b) * b


def _pe_kernel(xg_ref, wr_ref, w1c_ref, w1s_ref, b1_ref, w2_ref, b2_ref, o_ref):
    """One row tile, fully lane-dense via block-diagonal weights.

    xg_ref : (TMg, group*M)        -- `group` consecutive positions packed per row
    wr_ref : (group*M,      group*F_half)   block-diag of Wr^T
    w1c/w1s: (group*F_half, group*H)        block-diag of (1/sqrt(F_dim))*W1^T halves
    b1_ref : (1, group*H)                   tiled bias
    w2_ref : (group*H,      group*D)        block-diag of W2^T
    b2_ref : (1, group*D)                   tiled bias
    o_ref  : (TMg, group*D)        -- lane-dense packed output
    """
    xg = xg_ref[...].astype(jnp.float32)

    # projection for all `group` packed positions at once
    proj = jnp.dot(xg, wr_ref[...], preferred_element_type=jnp.float32)

    # Fourier features; the 1/sqrt(F_dim) scale is folded into w1c/w1s.
    c = jnp.cos(proj)
    s = jnp.sin(proj)

    # feats @ W1^T == cos @ W1c + sin @ W1s   (no lane concat needed)
    h = (jnp.dot(c, w1c_ref[...], preferred_element_type=jnp.float32)
         + jnp.dot(s, w1s_ref[...], preferred_element_type=jnp.float32)
         + b1_ref[...])

    # Exact GELU (torch.nn.GELU default): 0.5*x*(1+erf(x/sqrt(2)))
    # TODO(synk): switch to tanh-approx GELU (EUP slot) if downstream tolerance allows.
    inv_sqrt_2 = jnp.float32(0.7071067811865476)
    h = 0.5 * h * (1.0 + lax.erf(h * inv_sqrt_2))

    y = jnp.dot(h, w2_ref[...], preferred_element_type=jnp.float32) + b2_ref[...]
    o_ref[...] = y.astype(o_ref.dtype)


def learnable_fourier_pe(x, wr_t, w1_t, b1, w2_t, b2, *, tm=4096):
    """x: (B, N, M).  Weights pre-transposed: wr_t (M, F/2), w1_t (F, H), w2_t (H, D)."""
    B, N, M = x.shape
    F_half = wr_t.shape[1]
    F_dim = 2 * F_half
    H_dim = w1_t.shape[1]
    D = w2_t.shape[1]

    # Lane-density grouping: pack `group` consecutive positions per kernel row so
    # every intermediate (proj/cos/sin/h/y) and the output block are 128-lane dense.
    # (If D does not divide 128 this falls back to group=1 — a perf cliff via
    #  masked partial stores, not a correctness issue.)
    group = (128 // D) if (D <= 128 and 128 % D == 0) else 1
    unit = 8 * group                      # row-count granularity (sublane alignment)

    rows = B * N
    # Small-input clamp: never pad past the smallest aligned tile covering all rows.
    tm = min(tm, _round_up(rows, unit))
    # v7x megacore: guarantee >= 2 grid steps whenever rows allow it so the
    # "parallel" row axis can shard across both TensorCores.
    if rows >= 2 * unit:
        tm = min(tm, _round_up(pl.cdiv(rows, 2), unit))
    tm = max(unit, (tm // unit) * unit)

    rows_pad = pl.cdiv(rows, tm) * tm

    x2d = x.reshape(rows, M)
    if rows_pad != rows:
        x2d = jnp.pad(x2d, ((0, rows_pad - rows), (0, 0)))
    # Row-major regroup: same memory, just a (rows_pad//group, group*M) view.
    xg = x2d.reshape(rows_pad // group, group * M)

    # ---- weight prep (one-time, outside the kernel) ------------------------
    scale = jnp.float32(1.0 / np.sqrt(F_dim))        # folded into W1 halves
    w1c = (w1_t[:F_half] * scale).astype(jnp.float32)   # cos half of W1^T
    w1s = (w1_t[F_half:] * scale).astype(jnp.float32)   # sin half of W1^T

    eye_g = jnp.eye(group, dtype=jnp.float32)
    wr_bd = jnp.kron(eye_g, wr_t.astype(jnp.float32))    # (group*M,      group*F_half)
    w1c_bd = jnp.kron(eye_g, w1c)                        # (group*F_half, group*H)
    w1s_bd = jnp.kron(eye_g, w1s)                        # (group*F_half, group*H)
    w2_bd = jnp.kron(eye_g, w2_t.astype(jnp.float32))    # (group*H,      group*D)
    b1_bd = jnp.tile(b1.reshape(1, H_dim).astype(jnp.float32), (1, group))
    b2_bd = jnp.tile(b2.reshape(1, D).astype(jnp.float32), (1, group))

    tmg = tm // group
    grid = (rows_pad // tm,)

    outg = pl.pallas_call(
        _pe_kernel,
        out_shape=jax.ShapeDtypeStruct((rows_pad // group, group * D), x.dtype),
        grid_spec=pltpu.PrefetchScalarGridSpec(
            num_scalar_prefetch=0,
            grid=grid,
            in_specs=[
                # grouped x row tile
                pl.BlockSpec((tmg, group * M), lambda i: (i, 0)),
                # block-diag weights / tiled biases: full blocks, same every step
                pl.BlockSpec((group * M, group * F_half), lambda i: (0, 0)),
                pl.BlockSpec((group * F_half, group * H_dim), lambda i: (0, 0)),
                pl.BlockSpec((group * F_half, group * H_dim), lambda i: (0, 0)),
                pl.BlockSpec((1, group * H_dim), lambda i: (0, 0)),
                pl.BlockSpec((group * H_dim, group * D), lambda i: (0, 0)),
                pl.BlockSpec((1, group * D), lambda i: (0, 0)),
            ],
            out_specs=pl.BlockSpec((tmg, group * D), lambda i: (i, 0)),
        ),
        compiler_params=pltpu.CompilerParams(
            dimension_semantics=("parallel",),        # row axis shards across TCs on v7x
            vmem_limit_bytes=32 * 1024 * 1024,        # safe on v7x's 64 MiB physical VMEM
        ),
    )(xg, wr_bd, w1c_bd, w1s_bd, b1_bd, w2_bd, b2_bd)

    out2d = outg.reshape(rows_pad, D)[:rows]          # free ungroup + drop row padding
    return out2d.reshape(B, N, D)


def _reference(x, wr_t, w1_t, b1, w2_t, b2, f_dim):
    proj = x @ wr_t
    feats = (1.0 / np.sqrt(f_dim)) * jnp.concatenate(
        [jnp.cos(proj), jnp.sin(proj)], axis=-1
    )
    h = feats @ w1_t + b1
    h = 0.5 * h * (1.0 + lax.erf(h / np.sqrt(2.0)))
    return h @ w2_t + b2


if __name__ == "__main__":
    # Module hyperparameters (small, consistent with the forward's shapes).
    M = 4        # input coordinate dimension
    F_dim = 64   # Fourier feature dimension (F_dim//2 = 32)
    H_dim = 32   # MLP hidden dimension
    D = 32       # output positional-encoding dimension
    gamma = 1.0

    B, N = 2, 8  # batch, number of positions

    key = jax.random.PRNGKey(0)
    k_x, k_wr, k_w1, k_b1, k_w2, k_b2 = jax.random.split(key, 6)

    # Deterministic parameter init (shapes from __init__; Wr ~ std = gamma^-2 per spec).
    x = jax.random.normal(k_x, (B, N, M), dtype=jnp.float32)
    wr = (gamma ** -2) * jax.random.normal(k_wr, (F_dim // 2, M), jnp.float32)  # nn.Linear weight (out, in)
    w1 = 0.1 * jax.random.normal(k_w1, (H_dim, F_dim), jnp.float32)
    b1 = 0.1 * jax.random.normal(k_b1, (H_dim,), jnp.float32)
    w2 = 0.1 * jax.random.normal(k_w2, (D, H_dim), jnp.float32)
    b2 = 0.1 * jax.random.normal(k_b2, (D,), jnp.float32)

    # Pre-transpose weights so the kernel does (rows, in) @ (in, out).
    wr_t, w1_t, w2_t = wr.T, w1.T, w2.T

    out = learnable_fourier_pe(x, wr_t, w1_t, b1, w2_t, b2)
    out = jax.block_until_ready(out)

    ref = _reference(x, wr_t, w1_t, b1, w2_t, b2, F_dim)
    assert out.shape == (B, N, D)
    np.testing.assert_allclose(np.asarray(out), np.asarray(ref), rtol=1e-5, atol=1e-5)

    print("KERNEL_OK")
</pallas_src>

<mosaic_0001>
module attributes {stable_mosaic.version = 11 : i64} {
  func.func @_pe_kernel(%arg0: i32, %arg1: memref<8x16xf32, #tpu.memory_space<vmem>>, %arg2: memref<16x128xf32, #tpu.memory_space<vmem>>, %arg3: memref<128x128xf32, #tpu.memory_space<vmem>>, %arg4: memref<128x128xf32, #tpu.memory_space<vmem>>, %arg5: memref<1x128xf32, #tpu.memory_space<vmem>>, %arg6: memref<128x128xf32, #tpu.memory_space<vmem>>, %arg7: memref<1x128xf32, #tpu.memory_space<vmem>>, %arg8: memref<8x128xf32, #tpu.memory_space<vmem>>) attributes {dimension_semantics = [#tpu.dimension_semantics<parallel>], iteration_bounds = array<i64: 1>, scalar_prefetch = 0 : i64, scratch_operands = 0 : i64, tpu.core_type = #tpu.core_type<tc>, window_params = [{transform_indices = @transform_0, window_bounds = array<i64: 8, 16>}, {pipeline_mode = #tpu.pipeline_mode<synchronous>, transform_indices = @transform_1, window_bounds = array<i64: 16, 128>}, {pipeline_mode = #tpu.pipeline_mode<synchronous>, transform_indices = @transform_2, window_bounds = array<i64: 128, 128>}, {pipeline_mode = #tpu.pipeline_mode<synchronous>, transform_indices = @transform_3, window_bounds = array<i64: 128, 128>}, {pipeline_mode = #tpu.pipeline_mode<synchronous>, transform_indices = @transform_4, window_bounds = array<i64: 1, 128>}, {pipeline_mode = #tpu.pipeline_mode<synchronous>, transform_indices = @transform_5, window_bounds = array<i64: 128, 128>}, {pipeline_mode = #tpu.pipeline_mode<synchronous>, transform_indices = @transform_6, window_bounds = array<i64: 1, 128>}, {transform_indices = @transform_7, window_bounds = array<i64: 8, 128>}]} {
    %c0 = arith.constant 0 : index
    %c0_0 = arith.constant 0 : index
    %0 = vector.load %arg1[%c0, %c0_0] : memref<8x16xf32, #tpu.memory_space<vmem>>, vector<8x16xf32>
    %c0_1 = arith.constant 0 : index
    %c0_2 = arith.constant 0 : index
    %1 = vector.load %arg2[%c0_1, %c0_2] : memref<16x128xf32, #tpu.memory_space<vmem>>, vector<16x128xf32>
    %cst = arith.constant dense<0.000000e+00> : vector<8x128xf32>
    %2 = tpu.matmul %0, %1, %cst {dimension_numbers = #tpu.dot_dimension_numbers<[1], [0], [0], [1], [0, 0, 1, 1], [], []>} : vector<8x16xf32>, vector<16x128xf32>, vector<8x128xf32> -> vector<8x128xf32>
    %3 = math.cos %2 : vector<8x128xf32>
    %4 = math.sin %2 : vector<8x128xf32>
    %c0_3 = arith.constant 0 : index
    %c0_4 = arith.constant 0 : index
    %5 = vector.load %arg3[%c0_3, %c0_4] : memref<128x128xf32, #tpu.memory_space<vmem>>, vector<128x128xf32>
    %cst_5 = arith.constant dense<0.000000e+00> : vector<8x128xf32>
    %6 = tpu.matmul %3, %5, %cst_5 {dimension_numbers = #tpu.dot_dimension_numbers<[1], [0], [0], [1], [0, 0, 1, 1], [], []>} : vector<8x128xf32>, vector<128x128xf32>, vector<8x128xf32> -> vector<8x128xf32>
    %c0_6 = arith.constant 0 : index
    %c0_7 = arith.constant 0 : index
    %7 = vector.load %arg4[%c0_6, %c0_7] : memref<128x128xf32, #tpu.memory_space<vmem>>, vector<128x128xf32>
    %cst_8 = arith.constant dense<0.000000e+00> : vector<8x128xf32>
    %8 = tpu.matmul %4, %7, %cst_8 {dimension_numbers = #tpu.dot_dimension_numbers<[1], [0], [0], [1], [0, 0, 1, 1], [], []>} : vector<8x128xf32>, vector<128x128xf32>, vector<8x128xf32> -> vector<8x128xf32>
    %9 = arith.addf %6, %8 : vector<8x128xf32>
    %c0_9 = arith.constant 0 : index
    %c0_10 = arith.constant 0 : index
    %10 = vector.load %arg5[%c0_9, %c0_10] : memref<1x128xf32, #tpu.memory_space<vmem>>, vector<1x128xf32>
    %11 = vector.broadcast %10 : vector<1x128xf32> to vector<8x128xf32>
    %12 = arith.addf %9, %11 : vector<8x128xf32>
    %cst_11 = arith.constant 5.000000e-01 : f32
    %13 = vector.broadcast %cst_11 : f32 to vector<8x128xf32>
    %14 = arith.mulf %13, %12 : vector<8x128xf32>
    %cst_12 = arith.constant 0.707106769 : f32
    %15 = vector.broadcast %cst_12 : f32 to vector<8x128xf32>
    %16 = arith.mulf %12, %15 : vector<8x128xf32>
    %17 = math.erf %16 : vector<8x128xf32>
    %cst_13 = arith.constant 1.000000e+00 : f32
    %18 = vector.broadcast %cst_13 : f32 to vector<8x128xf32>
    %19 = arith.addf %18, %17 : vector<8x128xf32>
    %20 = arith.mulf %14, %19 : vector<8x128xf32>
    %c0_14 = arith.constant 0 : index
    %c0_15 = arith.constant 0 : index
    %21 = vector.load %arg6[%c0_14, %c0_15] : memref<128x128xf32, #tpu.memory_space<vmem>>, vector<128x128xf32>
    %cst_16 = arith.constant dense<0.000000e+00> : vector<8x128xf32>
    %22 = tpu.matmul %20, %21, %cst_16 {dimension_numbers = #tpu.dot_dimension_numbers<[1], [0], [0], [1], [0, 0, 1, 1], [], []>} : vector<8x128xf32>, vector<128x128xf32>, vector<8x128xf32> -> vector<8x128xf32>
    %c0_17 = arith.constant 0 : index
    %c0_18 = arith.constant 0 : index
    %23 = vector.load %arg7[%c0_17, %c0_18] : memref<1x128xf32, #tpu.memory_space<vmem>>, vector<1x128xf32>
    %24 = vector.broadcast %23 : vector<1x128xf32> to vector<8x128xf32>
    %25 = arith.addf %22, %24 : vector<8x128xf32>
    %c0_19 = arith.constant 0 : index
    %c0_20 = arith.constant 0 : index
    %26 = vector.load %arg8[%c0_19, %c0_20] : memref<8x128xf32, #tpu.memory_space<vmem>>, vector<8x128xf32>
    tpu.vector_store %arg8[%c0_19, %c0_20], %25 {strides = array<i32>} : memref<8x128xf32, #tpu.memory_space<vmem>>, vector<8x128xf32>,
    return
  }
  func.func @transform_0(%arg0: i32) -> (i32, i32) {
    %c0_i32 = arith.constant 0 : i32
    %c0_i32_0 = arith.constant 0 : i32
    return %arg0, %c0_i32 : i32, i32
  }
  func.func @transform_1(%arg0: i32) -> (i32, i32) {
    %c0_i32 = arith.constant 0 : i32
    %c0_i32_0 = arith.constant 0 : i32
    %c0_i32_1 = arith.constant 0 : i32
    return %c0_i32, %c0_i32_0 : i32, i32
  }
  func.func @transform_2(%arg0: i32) -> (i32, i32) {
    %c0_i32 = arith.constant 0 : i32
    %c0_i32_0 = arith.constant 0 : i32
    %c0_i32_1 = arith.constant 0 : i32
    return %c0_i32, %c0_i32_0 : i32, i32
  }
  func.func @transform_3(%arg0: i32) -> (i32, i32) {
    %c0_i32 = arith.constant 0 : i32
    %c0_i32_0 = arith.constant 0 : i32
    %c0_i32_1 = arith.constant 0 : i32
    return %c0_i32, %c0_i32_0 : i32, i32
  }
  func.func @transform_4(%arg0: i32) -> (i32, i32) {
    %c0_i32 = arith.constant 0 : i32
    %c0_i32_0 = arith.constant 0 : i32
    %c0_i32_1 = arith.constant 0 : i32
    return %c0_i32, %c0_i32_0 : i32, i32
  }
  func.func @transform_5(%arg0: i32) -> (i32, i32) {
    %c0_i32 = arith.constant 0 : i32
    %c0_i32_0 = arith.constant 0 : i32
    %c0_i32_1 = arith.constant 0 : i32
    return %c0_i32, %c0_i32_0 : i32, i32
  }
  func.func @transform_6(%arg0: i32) -> (i32, i32) {
    %c0_i32 = arith.constant 0 : i32
    %c0_i32_0 = arith.constant 0 : i32
    %c0_i32_1 = arith.constant 0 : i32
    return %c0_i32, %c0_i32_0 : i32, i32
  }
  func.func @transform_7(%arg0: i32) -> (i32, i32) {
    %c0_i32 = arith.constant 0 : i32
    %c0_i32_0 = arith.constant 0 : i32
    return %arg0, %c0_i32 : i32, i32
  }
}

</mosaic_0001>

<bundles_post_ra>
// kernel: tpu_custom_call.1
= control target key start
LH: loop header
LB: loop body
LE: loop exit
PB: predicated region body
PF: predicated region fallthrough
CT: control target
= control target key end

     0   :  { %12 = vsyncpa [#allocation3], 0  ;;  %s1293_s0 = inlined_call_operand.hbm [shape: f32[8,16], index: 0, kind: input, shape index: {}]   ;;  %s1294_s1 = inlined_call_operand.hbm [shape: f32[16,128], index: 1, kind: input, shape index: {}]   ;;  %s1295_s2 = inlined_call_operand.hbm [shape: f32[128,128], index: 2, kind: input, shape index: {}]   ;;  %s1296_s3 = inlined_call_operand.hbm [shape: f32[128,128], index: 3, kind: input, shape index: {}]   ;;  %s1297_s4 = inlined_call_operand.vmem [shape: f32[1,128], index: 4, kind: input, shape index: {}]   ;;  %s1298_s5 = inlined_call_operand.hbm [shape: f32[128,128], index: 5, kind: input, shape index: {}]   ;;  %s1299_s6 = inlined_call_operand.vmem [shape: f32[1,128], index: 6, kind: input, shape index: {}]   ;;  %s1300_s7 = inlined_call_operand.hbm [shape: f32[8,128], index: 7, kind: output, shape index: {}]  }
   0x1   :  { %13 = vsyncpa [#allocation6], 0 }
   0x2   :  { %14 = vsyncpa [#allocation9], 0 }
   0x3   :  { %15 = vsyncpa [#allocation4], 0  ;;  %s1092_s24 = smov [#allocation5]   ;;  %s952_s28 = scalar_lea.hbm %s1294_s1, 256 }
   0x4   :  { %s31_s25 = sshll.u32 %s1092_s24, 4  ;;  %p953_p0 = scmp.ne.s32.totalorder %s1294_s1, %s952_s28  ;;  %s32_s25 = int_to_ptr.vmem [resolvable:$true] %s31_s25 }
   0x5   :  { %p956_p1 = scmp.lt.u32.totalorder %s952_s28, %s1294_s1 }
   0x7   :  { %p958_p2 = pnand %p956_p1, %p953_p0 }
   0x9   :  { %961 = shalt.err (!%p958_p2)
}
   0xa   :  { %s962_s10 = scalar_lea.vmem %s32_s25, 256  ;;  %p967_p4 = scmp.lt.s32.totalorder %s32_s25, %s32_s25 }
   0xb   :  { %p963_p3 = scmp.ne.s32.totalorder %s32_s25, %s962_s10  ;;  %p968_p5 = scmp.lt.s32.totalorder %s962_s10, %s962_s10 }
   0xd   :  { %p969_p6 = por %p968_p5, %p967_p4 }
   0xf   :  { %p970_p7 = pnand %p969_p6, %p963_p3 }
  0x11   :  { %973 = shalt.err (!%p970_p7)
}
  0x12   :  { %s1093_s11 = smov 128   ;;  %s1094_s12 = smov 8  }
  0x13   :  { %37 = dma.hbm_to_vmem [thread:$0]  %s1294_s1, 256, %s32_s25, [#allocation6], %s1093_s11, %s1093_s11, %s1094_s12  }
  0x14   :  { %s1095_s15 = smov [#allocation8]   ;;  %s1096_s17 = smov [#allocation2]  }
  0x15   :  { %s55_s16 = sshll.u32 %s1095_s15, 4  ;;  %s22_s18 = sshll.u32 %s1096_s17, 4  ;;  %s56_s16 = int_to_ptr.vmem [resolvable:$true] %s55_s16  ;;  %s23_s18 = int_to_ptr.vmem [resolvable:$true] %s22_s18 }
  0x16   :  { %s974_s21 = scalar_lea.hbm %s1296_s3, 2048 }
  0x17   :  { %p975_p8 = scmp.ne.s32.totalorder %s1296_s3, %s974_s21  ;;  %p978_p9 = scmp.lt.u32.totalorder %s974_s21, %s1296_s3 }
  0x19   :  { %p980_p10 = pnand %p978_p9, %p975_p8 }
  0x1b   :  { %983 = shalt.err (!%p980_p10)
}
  0x1c   :  { %s984_s1 = scalar_lea.vmem %s56_s16, 2048  ;;  %p989_p12 = scmp.lt.s32.totalorder %s56_s16, %s56_s16 }
  0x1d   :  { %p985_p11 = scmp.ne.s32.totalorder %s56_s16, %s984_s1  ;;  %p990_p13 = scmp.lt.s32.totalorder %s984_s1, %s984_s1 }
  0x1f   :  { %p991_p0 = por %p990_p13, %p989_p12 }
  0x21   :  { %p992_p1 = pnand %p991_p0, %p985_p11 }
  0x23   :  { %995 = shalt.err (!%p992_p1)
}
  0x24   :  { %61 = dma.hbm_to_vmem [thread:$0]  %s1296_s3, 2048, %s56_s16, [#allocation9], %s1093_s11, %s1093_s11, %s1094_s12  }
  0x25   :  { %s996_s30 = scalar_lea.hbm %s1293_s0, 128 }
  0x26   :  { %p997_p2 = scmp.ne.s32.totalorder %s1293_s0, %s996_s30  ;;  %p1000_p3 = scmp.lt.u32.totalorder %s996_s30, %s1293_s0 }
  0x28   :  { %p1002_p4 = pnand %p1000_p3, %p997_p2 }
  0x2a   :  { %1005 = shalt.err (!%p1002_p4)
}
  0x2b   :  { %s1006_s14 = scalar_lea.vmem %s23_s18, 128  ;;  %p1011_p6 = scmp.lt.s32.totalorder %s23_s18, %s23_s18 }
  0x2c   :  { %p1007_p5 = scmp.ne.s32.totalorder %s23_s18, %s1006_s14  ;;  %p1012_p7 = scmp.lt.s32.totalorder %s1006_s14, %s1006_s14 }
  0x2e   :  { %p1013_p8 = por %p1012_p7, %p1011_p6 }
  0x30   :  { %p1014_p9 = pnand %p1013_p8, %p1007_p5 }
  0x32   :  { %1017 = shalt.err (!%p1014_p9)
}
  0x33   :  { %25 = dma.hbm_to_vmem [thread:$0]  %s1293_s0, 128, %s23_s18, [#allocation3]  }
  0x34   :  { %s1097_s16 = smov [#allocation7]   ;;  %s1098_s19 = smov [#allocation10]  }
  0x35   :  { %s43_s17 = sshll.u32 %s1097_s16, 4  ;;  %s69_s20 = sshll.u32 %s1098_s19, 4  ;;  %s44_s17 = int_to_ptr.vmem [resolvable:$true] %s43_s17  ;;  %s70_s20 = int_to_ptr.vmem [resolvable:$true] %s69_s20 }
  0x36   :  { %s1018_s23 = scalar_lea.hbm %s1295_s2, 2048 }
  0x37   :  { %p1019_p10 = scmp.ne.s32.totalorder %s1295_s2, %s1018_s23  ;;  %p1022_p11 = scmp.lt.u32.totalorder %s1018_s23, %s1295_s2 }
  0x39   :  { %p1024_p12 = pnand %p1022_p11, %p1019_p10 }
  0x3b   :  { %1027 = shalt.err (!%p1024_p12)
}
  0x3c   :  { %s1028_s0 = scalar_lea.vmem %s44_s17, 2048  ;;  %p1033_p0 = scmp.lt.s32.totalorder %s44_s17, %s44_s17 }
  0x3d   :  { %p1029_p13 = scmp.ne.s32.totalorder %s44_s17, %s1028_s0  ;;  %p1034_p1 = scmp.lt.s32.totalorder %s1028_s0, %s1028_s0 }
  0x3f   :  { %p1035_p2 = por %p1034_p1, %p1033_p0 }
  0x41   :  { %p1036_p3 = pnand %p1035_p2, %p1029_p13 }
  0x43   :  { %1039 = shalt.err (!%p1036_p3)
}
  0x44   :  { %49 = dma.hbm_to_vmem [thread:$0]  %s1295_s2, 2048, %s44_s17, [#allocation6], %s1093_s11, %s1093_s11, %s1094_s12  }
  0x45   :  { %s1040_s30 = scalar_lea.hbm %s1298_s5, 2048 }
  0x46   :  { %p1041_p4 = scmp.ne.s32.totalorder %s1298_s5, %s1040_s30  ;;  %p1044_p5 = scmp.lt.u32.totalorder %s1040_s30, %s1298_s5 }
  0x48   :  { %p1046_p6 = pnand %p1044_p5, %p1041_p4 }
  0x4a   :  { %1049 = shalt.err (!%p1046_p6)
}
  0x4b   :  { %s1050_s14 = scalar_lea.vmem %s70_s20, 2048  ;;  %p1055_p8 = scmp.lt.s32.totalorder %s70_s20, %s70_s20 }
  0x4c   :  { %p1051_p7 = scmp.ne.s32.totalorder %s70_s20, %s1050_s14  ;;  %p1056_p9 = scmp.lt.s32.totalorder %s1050_s14, %s1050_s14 }
  0x4e   :  { %p1057_p10 = por %p1056_p9, %p1055_p8 }
  0x50   :  { %p1058_p11 = pnand %p1057_p10, %p1051_p7 }
  0x52   :  { %1061 = shalt.err (!%p1058_p11)
}
  0x53   :  { %75 = dma.hbm_to_vmem [thread:$0]  %s1298_s5, 2048, %s70_s20, [#allocation9], %s1093_s11, %s1093_s11, %s1094_s12  }
  0x54   :  { %1084 = dma.done.wait [#allocation3], 128  }
  0x55   :  { %1085 = vsyncadd [#allocation3], 4294967168 }
  0x56   :  { %1086 = dma.done.wait [#allocation6], 2304  }
  0x57   :  { %1087 = vsyncadd [#allocation6], 4294964992 }
  0x58   :  { %1088 = dma.done.wait [#allocation9], 4096  }
  0x59   :  { %1089 = vsyncadd [#allocation9], 4294963200  ;;  %v1099_v0 = vmov 0.0|0.0   ;;  %vm1100_vm0 = vmmov 0   ;;  %v1101_v1 = vmov 0.0   ;;  %v94_v2 = vld [vmem:[#allocation5] sm:$0xff] }
  0x5a   :  { %850 = vmatprep.subr.bf16.mxu0 %v1099_v0  ;;  %742 = vmatprep.mubr.msk.f32.mxu0 %vm1100_vm0, %v1101_v1  ;;  %v95_v3 = vld [vmem:[#allocation5 + $0x8] sm:$0xff]  ;;  %v93_v5 = vld [vmem:[#allocation2] sm:$0xff]  ;;  %vm96_vm1 = vcmask 130048   ;;  %v393_v6 = vld [vmem:[#allocation8] sm:$0xff]  ;;  %s1108_s16 = smov [#allocation11]  }
  0x5b   :  { %853 = vmatprep.subr.bf16.mxu1 %v1099_v0  ;;  %777 = vmatprep.mubr.msk.f32.mxu1 %vm1100_vm0, %v1101_v1  ;;  %v851_v4 = vpack.c.bf16 %v95_v3, %v94_v2  ;;  %v394_v7 = vld [vmem:[#allocation8 + $0x8] sm:$0xff]  ;;  %v377_v8 = vld [vmem:[#allocation7] sm:$0xff]  ;;  %v395_v12 = vld [vmem:[#allocation8 + $0x10] sm:$0xff]  ;;  %s662_s17 = sshll.u32 %s1108_s16, 4  ;;  %s663_s17 = int_to_ptr.vmem [resolvable:$true] %s662_s17 }
  0x5c   :  { %v854_v9 = vpack.c.bf16 %v394_v7, %v393_v6  ;;  %v378_v10 = vld [vmem:[#allocation7 + $0x8] sm:$0xff]  ;;  %v396_v13 = vld [vmem:[#allocation8 + $0x18] sm:$0xff]  ;;  %v379_v14 = vld [vmem:[#allocation7 + $0x10] sm:$0xff]  ;;  %v1103_v6 = vmov 2475754826   ;;  %p1067_p13 = scmp.lt.s32.totalorder %s663_s17, %s663_s17 }
  0x5d   :  { %852 = vmatpush3.bf16.msra.mxu0 %v851_v4  ;;  %v878_v11 = vpack.c.bf16 %v378_v10, %v377_v8  ;;  %v857_v15 = vpack.c.bf16 %v396_v13, %v395_v12  ;;  %v380_v16 = vld [vmem:[#allocation7 + $0x18] sm:$0xff]  ;;  %v397_v18 = vld [vmem:[#allocation8 + $0x20] sm:$0xff]  ;;  %v398_v19 = vld [vmem:[#allocation8 + $0x28] sm:$0xff]  ;;  %v1102_v4 = vmov 683565275  }
  0x5e   :  { %877 = vmatprep.subr.bf16.mxu0 %v1099_v0  ;;  %855 = vmatpush3.bf16.msra.mxu1 %v854_v9  ;;  %v881_v17 = vpack.c.bf16 %v380_v16, %v379_v14  ;;  %v381_v20 = vld [vmem:[#allocation7 + $0x20] sm:$0xff]  ;;  %v860_v21 = vpack.c.bf16 %v398_v19, %v397_v18  ;;  %v382_v22 = vld [vmem:[#allocation7 + $0x28] sm:$0xff]  ;;  %v399_v24 = vld [vmem:[#allocation8 + $0x30] sm:$0xff]  ;;  %v1104_v9 = vmov 2131351028  }
  0x5f   :  { %856 = vmatprep.subr.bf16.mxu1 %v1099_v0  ;;  %v884_v23 = vpack.c.bf16 %v382_v22, %v381_v20  ;;  %v400_v25 = vld [vmem:[#allocation8 + $0x38] sm:$0xff]  ;;  %v383_v26 = vld [vmem:[#allocation7 + $0x30] sm:$0xff]  ;;  %v401_v30 = vld [vmem:[#allocation8 + $0x40] sm:$0xff]  ;;  %v1105_v12 = vmov 2102212464  }
  0x60   :  { %743 = vmatmul.mubr.msk.f32.vlgmr.msra.gmra.mrb[0].mxu0 %vm96_vm1, %v93_v5  ;;  %v863_v27 = vpack.c.bf16 %v400_v25, %v399_v24  ;;  %v384_v28 = vld [vmem:[#allocation7 + $0x38] sm:$0xff]  ;;  %v402_v31 = vld [vmem:[#allocation8 + $0x48] sm:$0xff]  ;;  %v385_v32 = vld [vmem:[#allocation7 + $0x40] sm:$0xff]  ;;  %v1107_v18 = vmov 1326507024  }
  0x61   :  { %812 = vmatprep.mubr.msk.f32.mxu0 %vm1100_vm0, %v1101_v1  ;;  %879 = vmatpush3.bf16.msra.mxu0 %v878_v11  ;;  %v887_v29 = vpack.c.bf16 %v384_v28, %v383_v26  ;;  %v866_v33 = vpack.c.bf16 %v402_v31, %v401_v30  ;;  %v386_v34 = vld [vmem:[#allocation7 + $0x48] sm:$0xff]  ;;  %v403_v35 = vld [vmem:[#allocation8 + $0x50] sm:$0xff]  ;;  %v404_v36 = vld [vmem:[#allocation8 + $0x58] sm:$0xff] }
  0x62   :  { %880 = vmatprep.subr.bf16.mxu0 %v1099_v0  ;;  %858 = vmatpush3.bf16.msra.mxu1 %v857_v15  ;;  %v890_v37 = vpack.c.bf16 %v386_v34, %v385_v32  ;;  %v387_v38 = vld [vmem:[#allocation7 + $0x50] sm:$0xff]  ;;  %v388_v39 = vld [vmem:[#allocation7 + $0x58] sm:$0xff]  ;;  %v869_v40 = vpack.c.bf16 %v404_v36, %v403_v35  ;;  %v405_v42 = vld [vmem:[#allocation8 + $0x60] sm:$0xff]  ;;  %v1106_v15 = vmov 920167782  }
  0x63   :  { %859 = vmatprep.subr.bf16.mxu1 %v1099_v0  ;;  %v893_v41 = vpack.c.bf16 %v388_v39, %v387_v38  ;;  %v406_v43 = vld [vmem:[#allocation8 + $0x68] sm:$0xff]  ;;  %v389_v44 = vld [vmem:[#allocation7 + $0x60] sm:$0xff]  ;;  %v407_v48 = vld [vmem:[#allocation8 + $0x70] sm:$0xff] }
  0x64   :  { %v390_v45 = vld [vmem:[#allocation7 + $0x68] sm:$0xff]  ;;  %v872_v46 = vpack.c.bf16 %v406_v43, %v405_v42  ;;  %v408_v49 = vld [vmem:[#allocation8 + $0x78] sm:$0xff]  ;;  %v391_v50 = vld [vmem:[#allocation7 + $0x70] sm:$0xff] }
  0x65   :  { %882 = vmatpush3.bf16.msra.mxu0 %v881_v17  ;;  %v896_v47 = vpack.c.bf16 %v390_v45, %v389_v44  ;;  %v392_v51 = vld [vmem:[#allocation7 + $0x78] sm:$0xff]  ;;  %v875_v52 = vpack.c.bf16 %v408_v49, %v407_v48 }
  0x66   :  { %883 = vmatprep.subr.bf16.mxu0 %v1099_v0  ;;  %861 = vmatpush3.bf16.msra.mxu1 %v860_v21  ;;  %v899_v53 = vpack.c.bf16 %v392_v51, %v391_v50 }
  0x67   :  { %862 = vmatprep.subr.bf16.mxu1 %v1099_v0 }
  0x69   :  { %885 = vmatpush3.bf16.msra.mxu0 %v884_v23 }
  0x6a   :  { %886 = vmatprep.subr.bf16.mxu0 %v1099_v0  ;;  %864 = vmatpush3.bf16.msra.mxu1 %v863_v27 }
  0x6b   :  { %865 = vmatprep.subr.bf16.mxu1 %v1099_v0 }
  0x6d   :  { %888 = vmatpush3.bf16.msra.mxu0 %v887_v29 }
  0x6e   :  { %889 = vmatprep.subr.bf16.mxu0 %v1099_v0  ;;  %867 = vmatpush3.bf16.msra.mxu1 %v866_v33 }
  0x6f   :  { %868 = vmatprep.subr.bf16.mxu1 %v1099_v0 }
  0x71   :  { %891 = vmatpush3.bf16.msra.mxu0 %v890_v37 }
  0x72   :  { %892 = vmatprep.subr.bf16.mxu0 %v1099_v0  ;;  %870 = vmatpush3.bf16.msra.mxu1 %v869_v40 }
  0x73   :  { %871 = vmatprep.subr.bf16.mxu1 %v1099_v0 }
  0x75   :  { %894 = vmatpush3.bf16.msra.mxu0 %v893_v41 }
  0x76   :  { %895 = vmatprep.subr.bf16.mxu0 %v1099_v0  ;;  %873 = vmatpush3.bf16.msra.mxu1 %v872_v46 }
  0x77   :  { %874 = vmatprep.subr.bf16.mxu1 %v1099_v0 }
  0x79   :  { %897 = vmatpush3.bf16.msra.mxu0 %v896_v47 }
  0x7a   :  { %898 = vmatprep.subr.bf16.mxu0 %v1099_v0  ;;  %876 = vmatpush3.bf16.msra.mxu1 %v875_v52 }
  0x7b   :  { %901 = vmatprep.subr.bf16.mxu1 %v1099_v0 }
  0x7d   :  { %900 = vmatpush3.bf16.msra.mxu0 %v899_v53 }
 0x133   :  { %v1245_v54 = vpop.f32.mrb[0].mxu0 }
 0x134   :  { %v173_v55 = vand.u32 2139095040, %v1245_v54  ;;  %v744_v56 = vpop.f32.mrb[1].mxu0  ;;  %v170_v60 = vand.u32 2147483647, %v1245_v54  ;;  %vm172_vm9 = vcmp.lt.s32.totalorder %v1245_v54, 0 }
 0x136   :  { %v174_v57 = vshrl.u32 %v173_v55, 23  ;;  %v177_v63 = vand.u32 8388607, %v170_v60  ;;  %vm171_vm10 = vcmp.le.f32.partialorder %v170_v60, 0.7853982 }
 0x138   :  { %v674_v58 = vadd.s32 4294967169, %v174_v57  ;;  %v178_v20 = vor.u32 8388608, %v177_v63 }
 0x13a   :  { %v180_v59 = vadd.s32 1, %v674_v58  ;;  %v218_v34 = vshll.u32 %v178_v20, 8 }
 0x13c   :  { %vm181_vm2 = vcmp.gt.s32.totalorder %v180_v59, 0 }
 0x13d   :  { %v182_v61 = vsel %vm181_vm2, %v180_v59, 0  ;;  %vm262_vm2 = vweird.f32 %v1245_v54 }
 0x13e   :  { %v184_v62 = vand.u32 31, %v182_v61  ;;  %v183_v3 = vshrl.u32 %v182_v61, 5 }
 0x140   :  { %v185_v2 = vsub.s32 32, %v184_v62  ;;  %v187_v5 = vshll.u32 %v1102_v4, %v184_v62  ;;  %v190_v7 = vshll.u32 %v1103_v6, %v184_v62  ;;  %v193_v11 = vshll.u32 %v1104_v9, %v184_v62 }
 0x141   :  { %v196_v14 = vshll.u32 %v1105_v12, %v184_v62  ;;  %v199_v17 = vshll.u32 %v1106_v15, %v184_v62  ;;  %vm202_vm3 = vcmp.lt.s32.totalorder %v183_v3, 1  ;;  %vm205_vm4 = vcmp.lt.s32.totalorder %v183_v3, 4 }
 0x142   :  { %v188_v8 = vshrl.u32 %v1103_v6, %v185_v2  ;;  %v191_v10 = vshrl.u32 %v1104_v9, %v185_v2  ;;  %v194_v13 = vshrl.u32 %v1105_v12, %v185_v2  ;;  %v197_v16 = vshrl.u32 %v1106_v15, %v185_v2 }
 0x143   :  { %v200_v19 = vshrl.u32 %v1107_v18, %v185_v2  ;;  %v186_v29 = vshrl.u32 %v1102_v4, %v185_v2  ;;  %vm204_vm5 = vcmp.lt.s32.totalorder %v183_v3, 3  ;;  %vm203_vm6 = vcmp.lt.s32.totalorder %v183_v3, 2  ;;  %v562_v18 = vld [vmem:[#allocation10] sm:$0xff] }
 0x144   :  { %v189_v21 = vor.u32 %v188_v8, %v187_v5  ;;  %v192_v22 = vor.u32 %v191_v10, %v190_v7  ;;  %v195_v23 = vor.u32 %v194_v13, %v193_v11  ;;  %v198_v24 = vor.u32 %v197_v16, %v196_v14 }
 0x145   :  { %v201_v25 = vor.u32 %v200_v19, %v199_v17  ;;  %v563_v19 = vld [vmem:[#allocation10 + $0x8] sm:$0xff] }
 0x146   :  { %v207_v26 = vsel %vm205_vm4, %v195_v23, 2102212464  ;;  %v210_v27 = vsel %vm202_vm3, %v189_v21, %v192_v22  ;;  %v214_v28 = vsel %vm202_vm3, %v192_v22, %v195_v23  ;;  %v211_v30 = vsel %vm205_vm4, %v198_v24, 920167782 }
 0x147   :  { %v215_v31 = vsel %vm205_vm4, %v201_v25, 1326507024  ;;  %v212_v32 = vsel %vm204_vm5, %v195_v23, %v211_v30  ;;  %v206_v35 = vsel %vm202_vm3, %v186_v29, %v189_v21  ;;  %v208_v36 = vsel %vm204_vm5, %v192_v22, %v207_v26  ;;  %v564_v30 = vld [vmem:[#allocation10 + $0x10] sm:$0xff] }
 0x148   :  { %v216_v33 = vsel %vm204_vm5, %v198_v24, %v215_v31  ;;  %v213_v37 = vsel %vm203_vm6, %v210_v27, %v212_v32  ;;  %v209_v43 = vsel %vm203_vm6, %v206_v35, %v208_v36  ;;  %v902_v24 = vpack.c.bf16 %v563_v19, %v562_v18  ;;  %v565_v31 = vld [vmem:[#allocation10 + $0x18] sm:$0xff]  ;;  %v566_v35 = vld [vmem:[#allocation10 + $0x20] sm:$0xff]  ;;  %v567_v36 = vld [vmem:[#allocation10 + $0x28] sm:$0xff] }
 0x149   :  { %v217_v38 = vsel %vm203_vm6, %v214_v28, %v216_v33  ;;  %v1254_v41 = vmul.u32.u64.low %v218_v34, %v213_v37  ;;  %v1255_v42 = vmul.u32.u64.high %v218_v34, %v213_v37, %v1254_v41  ;;  %v225_v45 = vmul.u32 %v218_v34, %v209_v43  ;;  %v573_v43 = vld [vmem:[#allocation10 + $0x58] sm:$0xff] }
 0x14a   :  { %v1251_v39 = vmul.u32.u64.low %v218_v34, %v217_v38  ;;  %v1252_v40 = vmul.u32.u64.high %v218_v34, %v217_v38, %v1251_v39  ;;  %v905_v34 = vpack.c.bf16 %v565_v31, %v564_v30  ;;  %v908_v37 = vpack.c.bf16 %v567_v36, %v566_v35  ;;  %v569_v38 = vld [vmem:[#allocation10 + $0x38] sm:$0xff] }
 0x14b   :  { %v228_v44 = vadd.s32 1, %v1255_v42 }
 0x14c   :  { %vm227_vm7 = vc.u32 %v1252_v40, %v1254_v41  ;;  %v226_v58 = vadd.s32 %v1254_v41, %v1252_v40  ;;  %v570_v40 = vld [vmem:[#allocation10 + $0x40] sm:$0xff]  ;;  %v571_v41 = vld [vmem:[#allocation10 + $0x48] sm:$0xff] }
 0x14d   :  { %v229_v46 = vsel %vm227_vm7, %v228_v44, %v1255_v42  ;;  %v572_v42 = vld [vmem:[#allocation10 + $0x50] sm:$0xff] }
 0x14e   :  { %v230_v47 = vadd.s32 %v229_v46, %v225_v45  ;;  %v917_v44 = vpack.c.bf16 %v573_v43, %v572_v42  ;;  %v574_v45 = vld [vmem:[#allocation10 + $0x60] sm:$0xff]  ;;  %v575_v46 = vld [vmem:[#allocation10 + $0x68] sm:$0xff] }
 0x150   :  { %v231_v48 = vadd.s32 536870912, %v230_v47 }
 0x152   :  { %v232_v49 = vshrl.u32 %v231_v48, 30  ;;  %v576_v48 = vld [vmem:[#allocation10 + $0x70] sm:$0xff] }
 0x154   :  { %v233_v50 = vshll.u32 %v232_v49, 30  ;;  %v256_v9 = vsub.s32 4, %v232_v49 }
 0x156   :  { %v234_v51 = vsub.s32 %v230_v47, %v233_v50  ;;  %v257_v12 = vsel %vm172_vm9, %v256_v9, %v232_v49  ;;  %v920_v47 = vpack.c.bf16 %v575_v46, %v574_v45  ;;  %v577_v49 = vld [vmem:[#allocation10 + $0x78] sm:$0xff] }
 0x157   :  { %v259_v14 = vsel %vm171_vm10, 0, %v257_v12  ;;  %v923_v50 = vpack.c.bf16 %v577_v49, %v576_v48 }
 0x158   :  { %v236_v52 = vsub.s32 0, %v234_v51  ;;  %v366_v15 = vadd.s32 3, %v259_v14  ;;  %v263_v17 = vand.u32 3, %v259_v14 }
 0x15a   :  { %v675_v53 = vmin.u32 %v236_v52, %v234_v51  ;;  %v367_v16 = vand.u32 3, %v366_v15  ;;  %vm268_vm12 = vcmp.eq.s32.totalorder %v263_v17, 2  ;;  %vm265_vm14 = vcmp.eq.s32.totalorder %v263_v17, 0 }
 0x15b   :  { %vm264_vm1 = vcmp.lt.s32.totalorder %v263_v17, 2 }
 0x15c   :  { %v238_v55 = vclz %v675_v53  ;;  %vm372_vm11 = vcmp.eq.s32.totalorder %v367_v16, 2  ;;  %vm369_vm13 = vcmp.eq.s32.totalorder %v367_v16, 0  ;;  %vm368_vm15 = vcmp.lt.s32.totalorder %v367_v16, 2  ;;  %v682_v53 = vld [vmem:[%s1297_s4] ss:$0 sm:$0xff]  ;;  %s1062_s4 = scalar_lea.vmem %s663_s17, 128 }
 0x15d   :  { %p1063_p12 = scmp.ne.s32.totalorder %s663_s17, %s1062_s4  ;;  %p1068_p0 = scmp.lt.s32.totalorder %s1062_s4, %s1062_s4 }
 0x15e   :  { %v676_v56 = vadd.s32 4294967294, %v238_v55 }
 0x15f   :  { %p1069_p1 = por %p1068_p0, %p1067_p13 }
 0x160   :  { %vm677_vm8 = vcmp.lt.s32.totalorder %v676_v56, 0 }
 0x161   :  { %v241_v57 = vsel %vm677_vm8, 0, %v676_v56  ;;  %p1070_p2 = pnand %p1069_p1, %p1063_p12 }
 0x162   :  { %v242_v59 = vsub.s32 32, %v241_v57  ;;  %v246_v61 = vsub.s32 4294967266, %v241_v57  ;;  %v243_v62 = vshll.u32 %v234_v51, %v241_v57 }
 0x164   :  { %v244_v63 = vshrl.u32 %v226_v58, %v242_v59  ;;  %v247_v2 = vadd.s32 127, %v246_v61 }
 0x166   :  { %v245_v3 = vor.u32 %v244_v63, %v243_v62  ;;  %v248_v4 = vshll.u32 %v247_v2, 23  ;;  %v683_v2 = vld [vmem:[%s1299_s6] ss:$0 sm:$0xff] }
 0x168   :  { %v249_v5 = vor.u32 4788187, %v248_v4  ;;  %v252_v7 = vcvt.s32.f32 %v245_v3 }
 0x16a   :  { %v250_v6 = vand.u32 2147483647, %v249_v5 }
 0x16c   :  { %v253_v8 = vmul.f32 %v252_v7, %v250_v6 }
 0x16e   :  { %v254_v10 = vxor.u32 2147483648, %v253_v8 }
 0x170   :  { %v255_v11 = vsel %vm172_vm9, %v254_v10, %v253_v8 }
 0x171   :  { %v258_v13 = vsel %vm171_vm10, %v1245_v54, %v255_v11  ;;  %v568_v54 = vld [vmem:[#allocation10 + $0x30] sm:$0xff] }
 0x172   :  { %946 = vcosq.f32 %v258_v13  ;;  %v911_v39 = vpack.c.bf16 %v569_v38, %v568_v54 }
 0x173   :  { %948 = vsinq.f32 %v258_v13 }
 0x17c   :  { %v947_v20 = vpop.eup %946 }
 0x17d   :  { %v949_v21 = vpop.eup %948  ;;  %v269_v22 = vxor.u32 2147483648, %v947_v20 }
 0x17e   :  { %v266_v23 = vxor.u32 2147483648, %v949_v21 }
 0x17f   :  { %v374_v60 = vsel %vm372_vm11, %v269_v22, %v949_v21  ;;  %v270_v25 = vsel %vm268_vm12, %v269_v22, %v949_v21 }
 0x180   :  { %v371_v26 = vsel %vm369_vm13, %v947_v20, %v266_v23  ;;  %v267_v27 = vsel %vm265_vm14, %v947_v20, %v266_v23 }
 0x181   :  { %v375_v28 = vsel %vm368_vm15, %v371_v26, %v374_v60  ;;  %v271_v29 = vsel %vm264_vm1, %v267_v27, %v270_v25 }
 0x182   :  { %v376_v32 = vsel %vm262_vm2, nan, %v375_v28  ;;  %v272_v33 = vsel %vm262_vm2, nan, %v271_v29 }
 0x183   :  { %778 = vmatmul.mubr.f32.vlgmr.msra.gmra.mrb[0].mxu1 %v376_v32  ;;  %813 = vmatmul.mubr.f32.vlgmr.msra.gmra.mrb[2].mxu0 %v272_v33 }
 0x184   :  { %903 = vmatpush3.bf16.msra.mxu1 %v902_v24  ;;  %847 = vmatprep.mubr.msk.f32.mxu1 %vm1100_vm0, %v1101_v1  ;;  %v914_v1 = vpack.c.bf16 %v571_v41, %v570_v40 }
 0x185   :  { %904 = vmatprep.subr.bf16.mxu1 %v1099_v0 }
 0x188   :  { %906 = vmatpush3.bf16.msra.mxu1 %v905_v34 }
 0x189   :  { %907 = vmatprep.subr.bf16.mxu1 %v1099_v0 }
 0x18c   :  { %909 = vmatpush3.bf16.msra.mxu1 %v908_v37 }
 0x18d   :  { %910 = vmatprep.subr.bf16.mxu1 %v1099_v0 }
 0x190   :  { %912 = vmatpush3.bf16.msra.mxu1 %v911_v39 }
 0x191   :  { %913 = vmatprep.subr.bf16.mxu1 %v1099_v0 }
 0x194   :  { %915 = vmatpush3.bf16.msra.mxu1 %v914_v1 }
 0x195   :  { %916 = vmatprep.subr.bf16.mxu1 %v1099_v0 }
 0x198   :  { %918 = vmatpush3.bf16.msra.mxu1 %v917_v44 }
 0x199   :  { %919 = vmatprep.subr.bf16.mxu1 %v1099_v0 }
 0x19c   :  { %921 = vmatpush3.bf16.msra.mxu1 %v920_v47 }
 0x19d   :  { %922 = vmatprep.subr.bf16.mxu1 %v1099_v0 }
 0x1a0   :  { %924 = vmatpush3.bf16.msra.mxu1 %v923_v50 }
 0x256   :  { %v475_v51 = vpop.f32.mrb[0].mxu1  ;;  %v545_v52 = vpop.f32.mrb[2].mxu0 }
 0x257   :  { %v546_v55 = vadd.f32 %v545_v52, %v475_v51  ;;  %v779_v56 = vpop.f32.mrb[1].mxu1  ;;  %v814_v57 = vpop.f32.mrb[3].mxu0 }
 0x259   :  { %v556_v58 = vadd.f32 %v682_v53, %v546_v55 }
 0x25b   :  { %v558_v59 = vmul.f32 0.70710677, %v556_v58  ;;  %v557_v62 = vmul.f32 0.5, %v556_v58 }
 0x25d   :  { %950 = verf.f32 %v558_v59 }
 0x267   :  { %v951_v61 = vpop.eup %950 }
 0x268   :  { %v560_v63 = vadd.f32 1.0, %v951_v61 }
 0x26a   :  { %v561_v0 = vmul.f32 %v560_v63, %v557_v62 }
 0x26c   :  { %848 = vmatmul.mubr.f32.vlgmr.msra.gmra.mrb[2].mxu1 %v561_v0 }
 0x33f   :  { %v651_v3 = vpop.f32.mrb[2].mxu1 }
 0x340   :  { %v652_v4 = vadd.f32 %v683_v2, %v651_v3  ;;  %v849_v5 = vpop.f32.mrb[3].mxu1 }
 0x342   :  { %655 = vst [vmem:[#allocation11] sm:$0xff] %v652_v4 }
 0x343   :  { %1073 = shalt.err (!%p1070_p2)
}
 0x344   :  { %s1074_s21 = scalar_lea.hbm %s1300_s7, 128 }
 0x345   :  { %p1075_p3 = scmp.ne.s32.totalorder %s1300_s7, %s1074_s21  ;;  %p1078_p4 = scmp.lt.u32.totalorder %s1074_s21, %s1300_s7 }
 0x347   :  { %p1080_p5 = pnand %p1078_p4, %p1075_p3 }
 0x349   :  { %1083 = shalt.err (!%p1080_p5)
}
 0x34a   :  { %665 = dma.vmem_to_hbm [thread:$0]  %s663_s17, 128, %s1300_s7, [#allocation4]  }
 0x34b   :  { %1090 = dma.done.wait [#allocation4], 128  }
 0x34c   :  { %1091 = vsyncadd [#allocation4], 4294967168 }
 0x34d   :  { %669 = vsyncpa [#allocation3], 1 }
 0x34e   :  { %670 = vsyncpa [#allocation6], 1 }
 0x34f   :  { %671 = vsyncpa [#allocation9], 1 }
 0x350   :  { %672 = vsyncpa [#allocation4], 1 }

</bundles_post_ra>
